<compile_context>
chip_gen: v5e
topology: v5e:2x2
jax: 0.10.0
libtpu: 0.0.40
codegen_flags: <defaults>
</compile_context>

<pallas_src>
import functools

import numpy as np
import jax
import jax.numpy as jnp
from jax.experimental import pallas as pl
from jax.experimental.pallas import tpu as pltpu


def _round_up(x, m):
    return ((x + m - 1) // m) * m


def _pair_mse_kernel(ei_ref, ej_ref, sqi_ref, sqj_ref, li_ref, lj_ref,
                     ri_ref, rj_ref, vsum_ref, gram_ref, *, nt):
    o = pl.program_id(1)          # circulant tile offset: j_tile = (i + o) % nt
    d = pl.program_id(2)          # feature chunk (innermost reduction axis)
    nd = pl.num_programs(2)

    # Zero the per-i-tile output on the first (o, d) visit of this i-tile.
    @pl.when(jnp.logical_and(o == 0, d == 0))
    def _():
        vsum_ref[...] = jnp.zeros_like(vsum_ref)

    # Fresh Gram accumulator for each (i, o) tile pair.
    @pl.when(d == 0)
    def _():
        gram_ref[...] = jnp.zeros_like(gram_ref)

    # Partial Gram tile: bf16 x bf16 on the MXU, f32 accumulation in VMEM scratch.
    gram_ref[...] += jax.lax.dot_general(
        ei_ref[...], ej_ref[...], (((1,), (1,)), ((), ())),
        preferred_element_type=jnp.float32)

    # Epilogue once per tile pair: d-invariant mask + norms + lane reduction.
    @pl.when(d == nd - 1)
    def _():
        m = jnp.logical_and(li_ref[...] == lj_ref[...],   # same label
                            ri_ref[...] != rj_ref[...])   # exclude p == q
        # sq_p + sq_q - 2 <E_p, E_q>: two-sided contribution of this tile pair.
        tmp = sqi_ref[...] + sqj_ref[...] - 2.0 * gram_ref[...]
        contrib = jnp.sum(jnp.where(m, tmp, 0.0), axis=-1, keepdims=True)
        # Diagonal tiles (o == 0) and, for even nt, o == nt/2 (visited from both
        # sides) are double counted by the two-sided formula -> weight 1/2.
        half = o == 0
        if nt % 2 == 0:
            half = jnp.logical_or(half, o == nt // 2)
        w = jnp.where(half, 0.5, 1.0).astype(jnp.float32)
        vsum_ref[...] += w * contrib


def onlinefeatmap_loss(embeddings, target, *, tile_b=256, tile_d=1024):
    """embeddings: (N, ...) float features; target: (N,) int labels. Scalar f32 loss."""
    n = embeddings.shape[0]
    emb2d = embeddings.reshape(n, -1)
    d = emb2d.shape[1]

    # Row-tile size: multiples of (8, 128). Keep >= 2 i-tiles when possible so the
    # "parallel" i axis can be split across v7x's two TensorCores.
    if n <= 128:
        tb = max(8, _round_up(n, 8))                 # tiny batch: single i-tile
    elif n <= 2 * max(tile_b, 128):
        tb = 128
    else:
        tb = _round_up(max(tile_b, 128), 128)
    n_pad = _round_up(n, tb)
    nt = n_pad // tb
    n_off = nt // 2 + 1                              # circulant offsets 0..nt//2

    td = _round_up(min(d, tile_d), 128)
    d_pad = _round_up(d, td)

    # bf16 into the MXU; zero-pad rows / feature columns.
    xb = emb2d.astype(jnp.bfloat16)
    x = jnp.pad(xb, ((0, n_pad - n), (0, d_pad - d)))

    # Precomputed row norms (f32) from the same bf16-rounded values the MXU sees.
    xf = xb.astype(jnp.float32)
    sq = jnp.sum(xf * xf, axis=1, keepdims=True)                   # (n, 1)
    sq = jnp.pad(sq, ((0, n_pad - n), (0, 0)))                     # (n_pad, 1)
    sq_col = sq
    sq_row = sq.reshape(1, n_pad)

    # Labels: padded rows get a value below every real label -> never positive.
    lab = target.astype(jnp.int32).reshape(n)
    labels = jnp.full((n_pad,), jnp.min(lab) - jnp.int32(1), dtype=jnp.int32)
    labels = labels.at[:n].set(lab)
    lab_col = labels.reshape(n_pad, 1)
    lab_row = labels.reshape(1, n_pad)

    # Global row indices (exclude the p == q diagonal inside o == 0 tiles).
    ridx = jnp.arange(n_pad, dtype=jnp.int32)
    ridx_col = ridx.reshape(n_pad, 1)
    ridx_row = ridx.reshape(1, n_pad)

    grid = (nt, n_off, d_pad // td)
    kernel = functools.partial(_pair_mse_kernel, nt=nt)

    i_side = lambda i, o, k: (i, 0)
    j_side = lambda i, o, k: (0, (i + o) % nt)

    vsum = pl.pallas_call(
        kernel,
        grid_spec=pltpu.PrefetchScalarGridSpec(
            num_scalar_prefetch=0,
            grid=grid,
            in_specs=[
                pl.BlockSpec((tb, td), lambda i, o, k: (i, k)),             # E rows, i side
                pl.BlockSpec((tb, td), lambda i, o, k: ((i + o) % nt, k)),  # E rows, j side
                pl.BlockSpec((tb, 1), i_side),                              # sq, i side
                pl.BlockSpec((1, tb), j_side),                              # sq, j side
                pl.BlockSpec((tb, 1), i_side),                              # labels, i side
                pl.BlockSpec((1, tb), j_side),                              # labels, j side
                pl.BlockSpec((tb, 1), i_side),                              # row idx, i side
                pl.BlockSpec((1, tb), j_side),                              # row idx, j side
            ],
            out_specs=pl.BlockSpec((tb, 1), i_side),                        # per-row pair-dist sum
            scratch_shapes=[pltpu.VMEM((tb, tb), jnp.float32)],             # Gram accumulator
        ),
        out_shape=jax.ShapeDtypeStruct((n_pad, 1), jnp.float32),
        compiler_params=pltpu.CompilerParams(
            dimension_semantics=("parallel", "arbitrary", "arbitrary"),
            vmem_limit_bytes=64 * 1024 * 1024,
        ),
    )(x, x, sq_col, sq_row, lab_col, lab_row, ridx_col, ridx_row)

    # Tiny final reduction + single normalization in the wrapper.
    pair_sq_sum = jnp.sum(vsum)                        # sum_{p<q, same label} ||E_p - E_q||^2
    same = (lab[:, None] == lab[None, :]).astype(jnp.float32)
    num_pos = 0.5 * (jnp.sum(same) - jnp.float32(n))   # number of positive pairs
    # NOTE: mirrors PyTorch — a batch with zero positive pairs yields NaN/Inf.
    return pair_sq_sum / (num_pos * jnp.float32(d))


def _reference(embeddings, target):
    """Pure-JAX mirror of the PyTorch forward (explicit pair enumeration, f32)."""
    n = embeddings.shape[0]
    e = jnp.asarray(embeddings).reshape(n, -1).astype(jnp.float32)
    idx_i, idx_j = np.triu_indices(n, k=1)
    lab = np.asarray(target)
    same = lab[idx_i] == lab[idx_j]
    diff = e[idx_i[same]] - e[idx_j[same]]
    return jnp.mean(diff * diff)


if __name__ == "__main__":
    key = jax.random.PRNGKey(0)
    k1, k2, k3, k4, k5, k6 = jax.random.split(key, 6)

    # 1) Feature-map-shaped embeddings: batch=8, (C,H,W)=(2,8,8) -> D=128. Single tile.
    emb1 = jax.random.normal(k1, (8, 2, 8, 8), dtype=jnp.float32)
    lab1 = jax.random.randint(k2, (8,), 0, 3, dtype=jnp.int32)   # 8 rows / 3 classes
    loss1 = jax.block_until_ready(onlinefeatmap_loss(emb1, lab1))
    ref1 = _reference(emb1, lab1)
    assert jnp.allclose(loss1, ref1, rtol=5e-3, atol=5e-4), (loss1, ref1)

    # 2) Even tile count (nt=2), row padding, circulant double-cover weight path.
    emb2 = jax.random.normal(k3, (160, 640), dtype=jnp.float32)
    lab2 = jax.random.randint(k4, (160,), 0, 5, dtype=jnp.int32)
    loss2 = jax.block_until_ready(onlinefeatmap_loss(emb2, lab2))
    ref2 = _reference(emb2, lab2)
    assert jnp.allclose(loss2, ref2, rtol=5e-3, atol=5e-4), (loss2, ref2)

    # 3) Odd tile count (nt=3), multi-step feature reduction, row + column padding.
    emb3 = jax.random.normal(k5, (288, 272), dtype=jnp.float32)
    lab3 = jax.random.randint(k6, (288,), 0, 7, dtype=jnp.int32)
    loss3 = jax.block_until_ready(
        onlinefeatmap_loss(emb3, lab3, tile_b=128, tile_d=128))
    ref3 = _reference(emb3, lab3)
    assert jnp.allclose(loss3, ref3, rtol=5e-3, atol=5e-4), (loss3, ref3)

    print("KERNEL_OK")
</pallas_src>

<mosaic_0001>
module attributes {stable_mosaic.version = 11 : i64} {
  func.func @_pair_mse_kernel(%arg0: i32, %arg1: i32, %arg2: i32, %arg3: memref<8x128xbf16, #tpu.memory_space<vmem>>, %arg4: memref<8x128xbf16, #tpu.memory_space<vmem>>, %arg5: memref<8x1xf32, #tpu.memory_space<vmem>>, %arg6: memref<1x8xf32, #tpu.memory_space<vmem>>, %arg7: memref<8x1xi32, #tpu.memory_space<vmem>>, %arg8: memref<1x8xi32, #tpu.memory_space<vmem>>, %arg9: memref<8x1xi32, #tpu.memory_space<vmem>>, %arg10: memref<1x8xi32, #tpu.memory_space<vmem>>, %arg11: memref<8x1xf32, #tpu.memory_space<vmem>>, %arg12: memref<8x8xf32, #tpu.memory_space<vmem>>) attributes {dimension_semantics = [#tpu.dimension_semantics<parallel>, #tpu.dimension_semantics<arbitrary>, #tpu.dimension_semantics<arbitrary>], iteration_bounds = array<i64: 1, 1, 1>, scalar_prefetch = 0 : i64, scratch_operands = 1 : i64, tpu.core_type = #tpu.core_type<tc>, window_params = [{transform_indices = @transform_0, window_bounds = array<i64: 8, 128>}, {transform_indices = @transform_1, window_bounds = array<i64: 8, 128>}, {transform_indices = @transform_2, window_bounds = array<i64: 8, 1>}, {transform_indices = @transform_3, window_bounds = array<i64: 1, 8>}, {transform_indices = @transform_4, window_bounds = array<i64: 8, 1>}, {transform_indices = @transform_5, window_bounds = array<i64: 1, 8>}, {transform_indices = @transform_6, window_bounds = array<i64: 8, 1>}, {transform_indices = @transform_7, window_bounds = array<i64: 1, 8>}, {transform_indices = @transform_8, window_bounds = array<i64: 8, 1>}]} {
    %c0_i32 = arith.constant 0 : i32
    %0 = arith.cmpi eq, %arg1, %c0_i32 : i32
    %c0_i32_0 = arith.constant 0 : i32
    %1 = arith.cmpi eq, %arg2, %c0_i32_0 : i32
    %2 = arith.andi %0, %1 : i1
    %3 = arith.extui %2 : i1 to i32
    %c0_i32_1 = arith.constant 0 : i32
    %4 = arith.cmpi ne, %3, %c0_i32_1 : i32
    scf.if %4 {
      %cst_13 = arith.constant 0.000000e+00 : f32
      %17 = vector.broadcast %cst_13 : f32 to vector<8x1xf32>
      %c0_14 = arith.constant 0 : index
      %c0_15 = arith.constant 0 : index
      %18 = vector.load %arg11[%c0_14, %c0_15] : memref<8x1xf32, #tpu.memory_space<vmem>>, vector<8x1xf32>
      tpu.vector_store %arg11[%c0_14, %c0_15], %17 {strides = array<i32>} : memref<8x1xf32, #tpu.memory_space<vmem>>, vector<8x1xf32>,
    } else {
    }
    %c0_i32_2 = arith.constant 0 : i32
    %5 = arith.cmpi eq, %arg2, %c0_i32_2 : i32
    %6 = arith.extui %5 : i1 to i32
    %c0_i32_3 = arith.constant 0 : i32
    %7 = arith.cmpi ne, %6, %c0_i32_3 : i32
    scf.if %7 {
      %cst_13 = arith.constant 0.000000e+00 : f32
      %17 = vector.broadcast %cst_13 : f32 to vector<8x8xf32>
      %c0_14 = arith.constant 0 : index
      %c0_15 = arith.constant 0 : index
      %18 = vector.load %arg12[%c0_14, %c0_15] : memref<8x8xf32, #tpu.memory_space<vmem>>, vector<8x8xf32>
      tpu.vector_store %arg12[%c0_14, %c0_15], %17 {strides = array<i32>} : memref<8x8xf32, #tpu.memory_space<vmem>>, vector<8x8xf32>,
    } else {
    }
    %c0 = arith.constant 0 : index
    %c0_4 = arith.constant 0 : index
    %8 = vector.load %arg12[%c0, %c0_4] : memref<8x8xf32, #tpu.memory_space<vmem>>, vector<8x8xf32>
    %c0_5 = arith.constant 0 : index
    %c0_6 = arith.constant 0 : index
    %9 = vector.load %arg3[%c0_5, %c0_6] : memref<8x128xbf16, #tpu.memory_space<vmem>>, vector<8x128xbf16>
    %c0_7 = arith.constant 0 : index
    %c0_8 = arith.constant 0 : index
    %10 = vector.load %arg4[%c0_7, %c0_8] : memref<8x128xbf16, #tpu.memory_space<vmem>>, vector<8x128xbf16>
    %cst = arith.constant dense<0.000000e+00> : vector<8x8xf32>
    %11 = tpu.matmul %9, %10, %cst {dimension_numbers = #tpu.dot_dimension_numbers<[1], [1], [0], [0], [0, 0, 1, 0], [], []>} : vector<8x128xbf16>, vector<8x128xbf16>, vector<8x8xf32> -> vector<8x8xf32>
    %12 = arith.addf %8, %11 : vector<8x8xf32>
    %c0_9 = arith.constant 0 : index
    %c0_10 = arith.constant 0 : index
    %13 = vector.load %arg12[%c0_9, %c0_10] : memref<8x8xf32, #tpu.memory_space<vmem>>, vector<8x8xf32>
    tpu.vector_store %arg12[%c0_9, %c0_10], %12 {strides = array<i32>} : memref<8x8xf32, #tpu.memory_space<vmem>>, vector<8x8xf32>,
    %c0_i32_11 = arith.constant 0 : i32
    %14 = arith.cmpi eq, %arg2, %c0_i32_11 : i32
    %15 = arith.extui %14 : i1 to i32
    %c0_i32_12 = arith.constant 0 : i32
    %16 = arith.cmpi ne, %15, %c0_i32_12 : i32
    scf.if %16 {
      %c0_13 = arith.constant 0 : index
      %c0_14 = arith.constant 0 : index
      %17 = vector.load %arg7[%c0_13, %c0_14] : memref<8x1xi32, #tpu.memory_space<vmem>>, vector<8x1xi32>
      %c0_15 = arith.constant 0 : index
      %c0_16 = arith.constant 0 : index
      %18 = vector.load %arg8[%c0_15, %c0_16] : memref<1x8xi32, #tpu.memory_space<vmem>>, vector<1x8xi32>
      %19 = vector.broadcast %17 : vector<8x1xi32> to vector<8x8xi32>
      %20 = vector.broadcast %18 : vector<1x8xi32> to vector<8x8xi32>
      %21 = arith.cmpi eq, %19, %20 : vector<8x8xi32>
      %c0_17 = arith.constant 0 : index
      %c0_18 = arith.constant 0 : index
      %22 = vector.load %arg9[%c0_17, %c0_18] : memref<8x1xi32, #tpu.memory_space<vmem>>, vector<8x1xi32>
      %c0_19 = arith.constant 0 : index
      %c0_20 = arith.constant 0 : index
      %23 = vector.load %arg10[%c0_19, %c0_20] : memref<1x8xi32, #tpu.memory_space<vmem>>, vector<1x8xi32>
      %24 = vector.broadcast %22 : vector<8x1xi32> to vector<8x8xi32>
      %25 = vector.broadcast %23 : vector<1x8xi32> to vector<8x8xi32>
      %26 = arith.cmpi ne, %24, %25 : vector<8x8xi32>
      %27 = arith.andi %21, %26 : vector<8x8xi1>
      %c0_21 = arith.constant 0 : index
      %c0_22 = arith.constant 0 : index
      %28 = vector.load %arg5[%c0_21, %c0_22] : memref<8x1xf32, #tpu.memory_space<vmem>>, vector<8x1xf32>
      %c0_23 = arith.constant 0 : index
      %c0_24 = arith.constant 0 : index
      %29 = vector.load %arg6[%c0_23, %c0_24] : memref<1x8xf32, #tpu.memory_space<vmem>>, vector<1x8xf32>
      %30 = vector.broadcast %28 : vector<8x1xf32> to vector<8x8xf32>
      %31 = vector.broadcast %29 : vector<1x8xf32> to vector<8x8xf32>
      %32 = arith.addf %30, %31 : vector<8x8xf32>
      %c0_25 = arith.constant 0 : index
      %c0_26 = arith.constant 0 : index
      %33 = vector.load %arg12[%c0_25, %c0_26] : memref<8x8xf32, #tpu.memory_space<vmem>>, vector<8x8xf32>
      %cst_27 = arith.constant 2.000000e+00 : f32
      %34 = vector.broadcast %cst_27 : f32 to vector<8x8xf32>
      %35 = arith.mulf %34, %33 : vector<8x8xf32>
      %36 = arith.subf %32, %35 : vector<8x8xf32>
      %cst_28 = arith.constant 0.000000e+00 : f32
      %37 = vector.broadcast %cst_28 : f32 to vector<8x8xf32>
      %38 = arith.select %27, %36, %37 : vector<8x8xi1>, vector<8x8xf32>
      %cst_29 = arith.constant dense<0.000000e+00> : vector<8xf32>
      %39 = vector.multi_reduction <add>, %38, %cst_29 [1] : vector<8x8xf32> to vector<8xf32>
      %40 = vector.shape_cast %39 : vector<8xf32> to vector<8x1xf32>
      %c0_i32_30 = arith.constant 0 : i32
      %41 = arith.cmpi eq, %arg1, %c0_i32_30 : i32
      %cst_31 = arith.constant 5.000000e-01 : f32
      %cst_32 = arith.constant 1.000000e+00 : f32
      %42 = arith.select %41, %cst_31, %cst_32 : f32
      %c0_33 = arith.constant 0 : index
      %c0_34 = arith.constant 0 : index
      %43 = vector.load %arg11[%c0_33, %c0_34] : memref<8x1xf32, #tpu.memory_space<vmem>>, vector<8x1xf32>
      %44 = vector.broadcast %42 : f32 to vector<8x1xf32>
      %45 = arith.mulf %44, %40 : vector<8x1xf32>
      %46 = arith.addf %43, %45 : vector<8x1xf32>
      %c0_35 = arith.constant 0 : index
      %c0_36 = arith.constant 0 : index
      %47 = vector.load %arg11[%c0_35, %c0_36] : memref<8x1xf32, #tpu.memory_space<vmem>>, vector<8x1xf32>
      tpu.vector_store %arg11[%c0_35, %c0_36], %46 {strides = array<i32>} : memref<8x1xf32, #tpu.memory_space<vmem>>, vector<8x1xf32>,
    } else {
    }
    return
  }
  func.func @transform_0(%arg0: i32, %arg1: i32, %arg2: i32) -> (i32, i32) {
    %c0_i32 = arith.constant 0 : i32
    return %arg0, %arg2 : i32, i32
  }
  func.func @transform_1(%arg0: i32, %arg1: i32, %arg2: i32) -> (i32, i32) {
    %0 = arith.addi %arg0, %arg1 : i32
    %c1_i32 = arith.constant 1 : i32
    %c0_i32 = arith.constant 0 : i32
    %1 = arith.cmpi eq, %c1_i32, %c0_i32 : i32
    %c1_i32_0 = arith.constant 1 : i32
    %2 = arith.select %1, %c1_i32_0, %c1_i32 : i32
    %3 = arith.remsi %0, %2 : i32
    %c0_i32_1 = arith.constant 0 : i32
    %4 = arith.cmpi ne, %3, %c0_i32_1 : i32
    %c0_i32_2 = arith.constant 0 : i32
    %5 = arith.cmpi slt, %3, %c0_i32_2 : i32
    %c0_i32_3 = arith.constant 0 : i32
    %6 = arith.cmpi slt, %2, %c0_i32_3 : i32
    %7 = arith.xori %5, %6 : i1
    %8 = arith.andi %7, %4 : i1
    %9 = arith.addi %3, %2 : i32
    %10 = arith.select %8, %9, %3 : i32
    %c0_i32_4 = arith.constant 0 : i32
    return %10, %arg2 : i32, i32
  }
  func.func @transform_2(%arg0: i32, %arg1: i32, %arg2: i32) -> (i32, i32) {
    %c0_i32 = arith.constant 0 : i32
    %c0_i32_0 = arith.constant 0 : i32
    return %arg0, %c0_i32 : i32, i32
  }
  func.func @transform_3(%arg0: i32, %arg1: i32, %arg2: i32) -> (i32, i32) {
    %0 = arith.addi %arg0, %arg1 : i32
    %c1_i32 = arith.constant 1 : i32
    %c0_i32 = arith.constant 0 : i32
    %1 = arith.cmpi eq, %c1_i32, %c0_i32 : i32
    %c1_i32_0 = arith.constant 1 : i32
    %2 = arith.select %1, %c1_i32_0, %c1_i32 : i32
    %3 = arith.remsi %0, %2 : i32
    %c0_i32_1 = arith.constant 0 : i32
    %4 = arith.cmpi ne, %3, %c0_i32_1 : i32
    %c0_i32_2 = arith.constant 0 : i32
    %5 = arith.cmpi slt, %3, %c0_i32_2 : i32
    %c0_i32_3 = arith.constant 0 : i32
    %6 = arith.cmpi slt, %2, %c0_i32_3 : i32
    %7 = arith.xori %5, %6 : i1
    %8 = arith.andi %7, %4 : i1
    %9 = arith.addi %3, %2 : i32
    %10 = arith.select %8, %9, %3 : i32
    %c0_i32_4 = arith.constant 0 : i32
    %c0_i32_5 = arith.constant 0 : i32
    return %c0_i32_4, %10 : i32, i32
  }
  func.func @transform_4(%arg0: i32, %arg1: i32, %arg2: i32) -> (i32, i32) {
    %c0_i32 = arith.constant 0 : i32
    %c0_i32_0 = arith.constant 0 : i32
    return %arg0, %c0_i32 : i32, i32
  }
  func.func @transform_5(%arg0: i32, %arg1: i32, %arg2: i32) -> (i32, i32) {
    %0 = arith.addi %arg0, %arg1 : i32
    %c1_i32 = arith.constant 1 : i32
    %c0_i32 = arith.constant 0 : i32
    %1 = arith.cmpi eq, %c1_i32, %c0_i32 : i32
    %c1_i32_0 = arith.constant 1 : i32
    %2 = arith.select %1, %c1_i32_0, %c1_i32 : i32
    %3 = arith.remsi %0, %2 : i32
    %c0_i32_1 = arith.constant 0 : i32
    %4 = arith.cmpi ne, %3, %c0_i32_1 : i32
    %c0_i32_2 = arith.constant 0 : i32
    %5 = arith.cmpi slt, %3, %c0_i32_2 : i32
    %c0_i32_3 = arith.constant 0 : i32
    %6 = arith.cmpi slt, %2, %c0_i32_3 : i32
    %7 = arith.xori %5, %6 : i1
    %8 = arith.andi %7, %4 : i1
    %9 = arith.addi %3, %2 : i32
    %10 = arith.select %8, %9, %3 : i32
    %c0_i32_4 = arith.constant 0 : i32
    %c0_i32_5 = arith.constant 0 : i32
    return %c0_i32_4, %10 : i32, i32
  }
  func.func @transform_6(%arg0: i32, %arg1: i32, %arg2: i32) -> (i32, i32) {
    %c0_i32 = arith.constant 0 : i32
    %c0_i32_0 = arith.constant 0 : i32
    return %arg0, %c0_i32 : i32, i32
  }
  func.func @transform_7(%arg0: i32, %arg1: i32, %arg2: i32) -> (i32, i32) {
    %0 = arith.addi %arg0, %arg1 : i32
    %c1_i32 = arith.constant 1 : i32
    %c0_i32 = arith.constant 0 : i32
    %1 = arith.cmpi eq, %c1_i32, %c0_i32 : i32
    %c1_i32_0 = arith.constant 1 : i32
    %2 = arith.select %1, %c1_i32_0, %c1_i32 : i32
    %3 = arith.remsi %0, %2 : i32
    %c0_i32_1 = arith.constant 0 : i32
    %4 = arith.cmpi ne, %3, %c0_i32_1 : i32
    %c0_i32_2 = arith.constant 0 : i32
    %5 = arith.cmpi slt, %3, %c0_i32_2 : i32
    %c0_i32_3 = arith.constant 0 : i32
    %6 = arith.cmpi slt, %2, %c0_i32_3 : i32
    %7 = arith.xori %5, %6 : i1
    %8 = arith.andi %7, %4 : i1
    %9 = arith.addi %3, %2 : i32
    %10 = arith.select %8, %9, %3 : i32
    %c0_i32_4 = arith.constant 0 : i32
    %c0_i32_5 = arith.constant 0 : i32
    return %c0_i32_4, %10 : i32, i32
  }
  func.func @transform_8(%arg0: i32, %arg1: i32, %arg2: i32) -> (i32, i32) {
    %c0_i32 = arith.constant 0 : i32
    %c0_i32_0 = arith.constant 0 : i32
    return %arg0, %c0_i32 : i32, i32
  }
}

</mosaic_0001>

<bundles_post_ra>
// kernel: tpu_custom_call.1
= control target key start
LH: loop header
LB: loop body
LE: loop exit
PB: predicated region body
PF: predicated region fallthrough
CT: control target
= control target key end

     0   :  { %v116_v1 = vmov 0   ;;  %vm41_vm0 = vcmask 64512   ;;  %v117_v6 = vmov 0.0   ;;  %vm36_vm1 = vcmask 7168   ;;  %s201_s1 = inlined_call_operand.vmem [shape: bf16[8,128], index: 1, kind: input, shape index: {}]   ;;  %s202_s2 = inlined_call_operand.vmem [shape: f32[8,1], index: 2, kind: input, shape index: {}]   ;;  %s203_s6 = inlined_call_operand.vmem [shape: s32[8,1], index: 6, kind: input, shape index: {}]   ;;  %s204_s3 = inlined_call_operand.vmem [shape: f32[1,8], index: 3, kind: input, shape index: {}]   ;;  %s205_s0 = inlined_call_operand.vmem [shape: bf16[8,128], index: 0, kind: input, shape index: {}]   ;;  %s206_s4 = inlined_call_operand.vmem [shape: s32[8,1], index: 4, kind: input, shape index: {}]   ;;  %s207_s7 = inlined_call_operand.vmem [shape: s32[1,8], index: 7, kind: input, shape index: {}]   ;;  %s208_s5 = inlined_call_operand.vmem [shape: s32[1,8], index: 5, kind: input, shape index: {}]   ;;  %s209_s8 = inlined_call_operand.vmem [shape: f32[8,1], index: 8, kind: output, shape index: {}]  }
   0x1   :  { %v45_v0 = vld [vmem:[%s201_s1] sm:$0xf]  ;;  %111 = vset.pattern.permute.xlu0 %v116_v1  ;;  %112 = vset.pattern.permute.xlu1 %v116_v1  ;;  %42 = vst.msk [vmem:[#allocation2] sm:$0xff] %vm41_vm0, %v117_v6 }
   0x2   :  { %v80_v2 = vld [vmem:[%s202_s2] sm:$0xff]  ;;  %53 = vmatpush.bf16.xpose.msra.mxu0 %v45_v0  ;;  %37 = vst.msk [vmem:[%s209_s8] sm:$0xff] %vm36_vm1, %v117_v6 }
   0x3   :  { %84 = vperm.xlu0 %111, %v80_v2   ;;  %v72_v3 = vld [vmem:[%s203_s6] sm:$0xff] }
   0x4   :  { %75 = vperm.xlu1 %112, %v72_v3   ;;  %v44_v4 = vld [vmem:[%s205_s0] sm:$0xf] }
   0x5   :  { %v65_v5 = vld [vmem:[%s206_s4] sm:$0xff] }
   0x6   :  { %v113_v11 = vld [vmem:[%s204_s3] ss:$0 sm:$0xff] }
   0x7   :  { %v114_v12 = vld [vmem:[%s207_s7] ss:$0 sm:$0xff] }
   0x8   :  { %v43_v8 = vld [vmem:[#allocation2] sm:$0xff] }
   0x9   :  { %54 = vmatmul.bf16.vlgmr.msra.gmra.mxu0 %v44_v4  ;;  %v115_v14 = vld [vmem:[%s208_s5] ss:$0 sm:$0xff] }
   0xa   :  { %v99_v23 = vld [vmem:[%s209_s8] sm:$0xff] }
   0xb   :  { %68 = vperm.xlu0 %111, %v65_v5  }
  0x75   :  { %v85_v7 = vpop.permute.xlu0 %84 }
  0x76   :  { %v76_v13 = vpop.permute.xlu1 %75  ;;  %v90_v18 = vadd.f32 %v113_v11, %v85_v7 }
  0x77   :  { %vm78_vm2 = vcmp.ne.s32.totalorder %v76_v13, %v114_v12 }
  0x7d   :  { %v69_v15 = vpop.permute.xlu0 %68 }
  0x7e   :  { %vm71_vm3 = vcmp.eq.s32.totalorder %v69_v15, %v115_v14 }
  0x7f   :  { %vm79_vm4 = vmand %vm71_vm3, %vm78_vm2 }
  0x86   :  { %v55_v9 = vpop.f32.mrf.mxu0 }
  0x87   :  { %v59_v10 = vadd.f32 %v55_v9, %v43_v8 }
  0x89   :  { %61 = vst.msk [vmem:[#allocation2] sm:$0xff] %vm41_vm0, %v59_v10 }
  0x8e   :  { %v57_v16 = vpop.f32.mrf.mxu0 }
  0x90   :  { %v91_v17 = vld [vmem:[#allocation2] sm:$0xff] }
  0x91   :  { %v92_v19 = vmul.f32 2.0, %v91_v17 }
  0x93   :  { %v93_v20 = vsub.f32 %v90_v18, %v92_v19 }
  0x95   :  { %v94_v21 = vsel %vm79_vm4, %v93_v20, 0.0 }
  0x96   :  { %v95_v22 = vsel %vm41_vm0, %v94_v21, 0.0 }
  0x97   :  { %96 = vadd.xlane.f32.xlu1 %v95_v22 }
 0x10a   :  { %v97_v24 = vpop.xlane.xlu1 %96 }
 0x10b   :  { %v101_v25 = vmul.f32 0.5, %v97_v24 }
 0x10d   :  { %v102_v26 = vadd.f32 %v101_v25, %v99_v23 }
 0x10f   :  { %104 = vst.msk [vmem:[%s209_s8] sm:$0xff] %vm36_vm1, %v102_v26 }

</bundles_post_ra>
